<compile_context>
chip_gen: v7x
topology: tpu7x:2x2x1
jax: 0.10.0
libtpu: 0.0.40
codegen_flags: <defaults>
</compile_context>

<pallas_src>
import math

import jax
import jax.numpy as jnp
from jax.experimental import pallas as pl
from jax.experimental.pallas import tpu as pltpu

# ---- config (small, consistent with the module) ----
B = 2          # batch
T = 8          # sequence length (block_size)
C = 32         # n_embd
H = 4          # n_head
D = C // H     # head dim
G = H * B      # merged (head, batch) axis for batched attention einsums
EPS = 1e-5     # nn.LayerNorm default
NEG_INF = -1e30  # finite mask value (identical softmax result, no -inf - -inf NaN risk)


def _layernorm(v, w, b):
    # v: (R, C), w/b: (1, C)
    mu = jnp.mean(v, axis=-1, keepdims=True)
    var = jnp.mean((v - mu) ** 2, axis=-1, keepdims=True)
    return (v - mu) * jax.lax.rsqrt(var + EPS) * w + b


def _gelu_tanh(v):
    # GELU(approximate='tanh'): 0.5*x*(1 + tanh(sqrt(2/pi)*(x + 0.044715*x^3)))
    c = math.sqrt(2.0 / math.pi)
    return 0.5 * v * (1.0 + jnp.tanh(c * (v + 0.044715 * v * v * v)))


def block_kernel(x_ref,
                 ln1w_ref, ln1b_ref,
                 wqkv_ref, bqkv_ref,
                 waoh_ref, bao_ref,
                 ln2w_ref, ln2b_ref,
                 wfc_ref, bfc_ref,
                 wmo_ref, bmo_ref,
                 o_ref):
    x = x_ref[...]                                       # (B*T, C), f32

    # ---------------- attention branch ----------------
    h = _layernorm(x, ln1w_ref[...], ln1b_ref[...])      # f32

    # fused QKV projection for all B*T rows: one MXU matmul (16,32)x(32,96),
    # bf16 operands -> f32 accumulate. Scale 1/sqrt(D) is pre-folded into Wq/bq.
    qkv = jnp.dot(h.astype(jnp.bfloat16), wqkv_ref[...],
                  preferred_element_type=jnp.float32) + bqkv_ref[...]   # (B*T, 3C) f32

    # Head-major gather done ONCE: (G, T, D) with g = head*B + batch.
    # Leading-axis concat of static lane slices; all later attention math is batched over G.
    def heads(base):
        return jnp.concatenate(
            [qkv[:, base + hh * D: base + (hh + 1) * D].reshape(B, T, D)
             for hh in range(H)], axis=0)                # (G, T, D)

    q_g = heads(0)
    k_g = heads(C)
    v_g = heads(2 * C)

    # additive causal mask, built once (replaces per-head selects)
    row = jax.lax.broadcasted_iota(jnp.int32, (G, T, T), 1)
    col = jax.lax.broadcasted_iota(jnp.int32, (G, T, T), 2)
    mask_add = jnp.where(row >= col, 0.0, NEG_INF)       # (G, T, T)

    # one batched score einsum + one batched PV einsum (replaces 8 tiny per-head ones)
    s = jnp.einsum('gtd,gsd->gts', q_g, k_g,
                   preferred_element_type=jnp.float32) + mask_add       # (G, T, T)
    s = s - jnp.max(s, axis=-1, keepdims=True)           # keep for overflow safety
    p = jnp.exp(s)
    p = p * pl.reciprocal(jnp.sum(p, axis=-1, keepdims=True), approx=True)
    oh = jnp.einsum('gts,gsd->gtd', p, v_g,
                    preferred_element_type=jnp.float32)                 # (G, T, D)

    # Output projection: one batched contraction over heads against the pre-split
    # (H, D, C) weight, then a cheap leading-axis sum. oh.reshape is a pure
    # leading-dim reshape (minor dim unchanged): (G,T,D) -> (H, B*T, D).
    oh_hm = oh.reshape(H, B * T, D)
    y_heads = jnp.einsum('hrd,hdc->hrc',
                         oh_hm.astype(jnp.bfloat16), waoh_ref[...],
                         preferred_element_type=jnp.float32)            # (H, B*T, C)
    y_proj = jnp.sum(y_heads, axis=0)                    # (B*T, C)

    x1 = x + y_proj + bao_ref[...]                       # residual 1, f32

    # ---------------- MLP branch ----------------
    h2 = _layernorm(x1, ln2w_ref[...], ln2b_ref[...])
    ff = jnp.dot(h2.astype(jnp.bfloat16), wfc_ref[...],
                 preferred_element_type=jnp.float32) + bfc_ref[...]     # (B*T, 4C)
    ff = _gelu_tanh(ff)
    ff = jnp.dot(ff.astype(jnp.bfloat16), wmo_ref[...],
                 preferred_element_type=jnp.float32) + bmo_ref[...]     # (B*T, C)

    # TODO(synk): a fully lane-dense (4, 128) output layout would need an in-kernel
    # minor-dim reshape of (16, 32); at this size the masked store is a single vreg,
    # so the relayout risk is not worth it here (it matters at scaled-up shapes).
    o_ref[...] = x1 + ff                                 # residual 2


def _full_spec(shape):
    # whole array as a single block (grid=(1,))
    nd = len(shape)
    return pl.BlockSpec(shape, lambda *_, nd=nd: (0,) * nd)


@jax.jit
def gpt2_block(x, params):
    (ln1w, ln1b, wqkv, bqkv, wao, bao, ln2w, ln2b, wfc, bfc, wmo, bmo) = params

    # fold batch into rows (free, wrapper-side)
    x2 = x.reshape(B * T, C)

    # fold the 1/sqrt(D) attention scale into the Q projection (wrapper-side, free)
    scale = 1.0 / math.sqrt(D)
    wqkv_s = jnp.concatenate([wqkv[:, :C] * scale, wqkv[:, C:]], axis=1)
    bqkv_s = jnp.concatenate([bqkv[:, :C] * scale, bqkv[:, C:]], axis=1)

    # weights for MXU matmuls as bf16; attention-output weight pre-split per head (H, D, C)
    wqkv_bf = wqkv_s.astype(jnp.bfloat16)
    waoh_bf = wao.reshape(H, D, C).astype(jnp.bfloat16)
    wfc_bf = wfc.astype(jnp.bfloat16)
    wmo_bf = wmo.astype(jnp.bfloat16)

    operands = (x2, ln1w, ln1b, wqkv_bf, bqkv_s, waoh_bf, bao,
                ln2w, ln2b, wfc_bf, bfc, wmo_bf, bmo)
    in_specs = [_full_spec(a.shape) for a in operands]

    out2 = pl.pallas_call(
        block_kernel,
        out_shape=jax.ShapeDtypeStruct((B * T, C), jnp.float32),
        grid_spec=pltpu.PrefetchScalarGridSpec(
            num_scalar_prefetch=0,
            grid=(1,),                                            # single kernel body
            in_specs=in_specs,
            out_specs=pl.BlockSpec((B * T, C), lambda i: (0, 0)),
        ),
        compiler_params=pltpu.CompilerParams(
            dimension_semantics=("arbitrary",)),
    )(*operands)

    return out2.reshape(B, T, C)


def gpt2_block_ref(x, params):
    # pure-JAX f32 reference of the PyTorch Block forward (for a tolerance check)
    (ln1w, ln1b, wqkv, bqkv, wao, bao, ln2w, ln2b, wfc, bfc, wmo, bmo) = params

    def ln(v, w, b):
        mu = v.mean(-1, keepdims=True)
        var = ((v - mu) ** 2).mean(-1, keepdims=True)
        return (v - mu) / jnp.sqrt(var + EPS) * w + b

    h = ln(x, ln1w[0], ln1b[0])
    qkv = h @ wqkv + bqkv[0]
    q, k, v = qkv[..., :C], qkv[..., C:2 * C], qkv[..., 2 * C:]
    q = q.reshape(B, T, H, D).transpose(0, 2, 1, 3)
    k = k.reshape(B, T, H, D).transpose(0, 2, 1, 3)
    v = v.reshape(B, T, H, D).transpose(0, 2, 1, 3)
    s = (q @ jnp.swapaxes(k, -1, -2)) / math.sqrt(D)
    mask = jnp.tril(jnp.ones((T, T), dtype=bool))
    s = jnp.where(mask, s, -jnp.inf)
    p = jax.nn.softmax(s, axis=-1)
    y = (p @ v).transpose(0, 2, 1, 3).reshape(B, T, C)
    y = y @ wao + bao[0]
    x1 = x + y
    h2 = ln(x1, ln2w[0], ln2b[0])
    ff = jax.nn.gelu(h2 @ wfc + bfc[0], approximate=True)
    ff = ff @ wmo + bmo[0]
    return x1 + ff


def init_params(key):
    ks = jax.random.split(key, 8)
    std = 0.02
    ln1w = jnp.ones((1, C), jnp.float32)
    ln1b = jnp.zeros((1, C), jnp.float32)
    wqkv = (std * jax.random.normal(ks[0], (C, 3 * C))).astype(jnp.float32)
    bqkv = (0.01 * jax.random.normal(ks[1], (1, 3 * C))).astype(jnp.float32)
    wao = (std * jax.random.normal(ks[2], (C, C))).astype(jnp.float32)
    bao = (0.01 * jax.random.normal(ks[3], (1, C))).astype(jnp.float32)
    ln2w = jnp.ones((1, C), jnp.float32)
    ln2b = jnp.zeros((1, C), jnp.float32)
    wfc = (std * jax.random.normal(ks[4], (C, 4 * C))).astype(jnp.float32)
    bfc = (0.01 * jax.random.normal(ks[5], (1, 4 * C))).astype(jnp.float32)
    wmo = (std * jax.random.normal(ks[6], (4 * C, C))).astype(jnp.float32)
    bmo = (0.01 * jax.random.normal(ks[7], (1, C))).astype(jnp.float32)
    return (ln1w, ln1b, wqkv, bqkv, wao, bao, ln2w, ln2b, wfc, bfc, wmo, bmo)


if __name__ == "__main__":
    key = jax.random.PRNGKey(0)
    kx, kp = jax.random.split(key)
    x = jax.random.normal(kx, (B, T, C), dtype=jnp.float32)
    params = init_params(kp)

    out = gpt2_block(x, params)
    jax.block_until_ready(out)
    assert out.shape == (B, T, C) and out.dtype == jnp.float32
    assert bool(jnp.all(jnp.isfinite(out)))

    # bf16 MXU inputs + approx reciprocal => not bit-identical to f32; generous tolerance.
    ref = gpt2_block_ref(x, params)
    assert float(jnp.max(jnp.abs(out - ref))) < 5e-2

    print("KERNEL_OK")
</pallas_src>

<mosaic_0001>
module attributes {stable_mosaic.version = 11 : i64} {
  func.func @block_kernel(%arg0: i32, %arg1: memref<16x32xf32, #tpu.memory_space<vmem>>, %arg2: memref<1x32xf32, #tpu.memory_space<vmem>>, %arg3: memref<1x32xf32, #tpu.memory_space<vmem>>, %arg4: memref<32x96xbf16, #tpu.memory_space<vmem>>, %arg5: memref<1x96xf32, #tpu.memory_space<vmem>>, %arg6: memref<4x8x32xbf16, #tpu.memory_space<vmem>>, %arg7: memref<1x32xf32, #tpu.memory_space<vmem>>, %arg8: memref<1x32xf32, #tpu.memory_space<vmem>>, %arg9: memref<1x32xf32, #tpu.memory_space<vmem>>, %arg10: memref<32x128xbf16, #tpu.memory_space<vmem>>, %arg11: memref<1x128xf32, #tpu.memory_space<vmem>>, %arg12: memref<128x32xbf16, #tpu.memory_space<vmem>>, %arg13: memref<1x32xf32, #tpu.memory_space<vmem>>, %arg14: memref<16x32xf32, #tpu.memory_space<vmem>>) attributes {dimension_semantics = [#tpu.dimension_semantics<arbitrary>], iteration_bounds = array<i64: 1>, scalar_prefetch = 0 : i64, scratch_operands = 0 : i64, tpu.core_type = #tpu.core_type<tc>, window_params = [{pipeline_mode = #tpu.pipeline_mode<synchronous>, transform_indices = @transform_0, window_bounds = array<i64: 16, 32>}, {pipeline_mode = #tpu.pipeline_mode<synchronous>, transform_indices = @transform_1, window_bounds = array<i64: 1, 32>}, {pipeline_mode = #tpu.pipeline_mode<synchronous>, transform_indices = @transform_2, window_bounds = array<i64: 1, 32>}, {pipeline_mode = #tpu.pipeline_mode<synchronous>, transform_indices = @transform_3, window_bounds = array<i64: 32, 96>}, {pipeline_mode = #tpu.pipeline_mode<synchronous>, transform_indices = @transform_4, window_bounds = array<i64: 1, 96>}, {pipeline_mode = #tpu.pipeline_mode<synchronous>, transform_indices = @transform_5, window_bounds = array<i64: 4, 8, 32>}, {pipeline_mode = #tpu.pipeline_mode<synchronous>, transform_indices = @transform_6, window_bounds = array<i64: 1, 32>}, {pipeline_mode = #tpu.pipeline_mode<synchronous>, transform_indices = @transform_7, window_bounds = array<i64: 1, 32>}, {pipeline_mode = #tpu.pipeline_mode<synchronous>, transform_indices = @transform_8, window_bounds = array<i64: 1, 32>}, {pipeline_mode = #tpu.pipeline_mode<synchronous>, transform_indices = @transform_9, window_bounds = array<i64: 32, 128>}, {pipeline_mode = #tpu.pipeline_mode<synchronous>, transform_indices = @transform_10, window_bounds = array<i64: 1, 128>}, {pipeline_mode = #tpu.pipeline_mode<synchronous>, transform_indices = @transform_11, window_bounds = array<i64: 128, 32>}, {pipeline_mode = #tpu.pipeline_mode<synchronous>, transform_indices = @transform_12, window_bounds = array<i64: 1, 32>}, {pipeline_mode = #tpu.pipeline_mode<synchronous>, transform_indices = @transform_13, window_bounds = array<i64: 16, 32>}]} {
    %c0 = arith.constant 0 : index
    %c0_0 = arith.constant 0 : index
    %0 = vector.load %arg1[%c0, %c0_0] : memref<16x32xf32, #tpu.memory_space<vmem>>, vector<16x32xf32>
    %c0_1 = arith.constant 0 : index
    %c0_2 = arith.constant 0 : index
    %1 = vector.load %arg2[%c0_1, %c0_2] : memref<1x32xf32, #tpu.memory_space<vmem>>, vector<1x32xf32>
    %c0_3 = arith.constant 0 : index
    %c0_4 = arith.constant 0 : index
    %2 = vector.load %arg3[%c0_3, %c0_4] : memref<1x32xf32, #tpu.memory_space<vmem>>, vector<1x32xf32>
    %cst = arith.constant dense<0.000000e+00> : vector<16xf32>
    %3 = vector.multi_reduction <add>, %0, %cst [1] : vector<16x32xf32> to vector<16xf32>
    %4 = vector.shape_cast %3 : vector<16xf32> to vector<16x1xf32>
    %cst_5 = arith.constant 3.200000e+01 : f32
    %5 = vector.broadcast %cst_5 : f32 to vector<16x1xf32>
    %6 = arith.divf %4, %5 : vector<16x1xf32>
    %7 = vector.broadcast %6 : vector<16x1xf32> to vector<16x32xf32>
    %8 = arith.subf %0, %7 : vector<16x32xf32>
    %9 = arith.mulf %8, %8 : vector<16x32xf32>
    %cst_6 = arith.constant dense<0.000000e+00> : vector<16xf32>
    %10 = vector.multi_reduction <add>, %9, %cst_6 [1] : vector<16x32xf32> to vector<16xf32>
    %11 = vector.shape_cast %10 : vector<16xf32> to vector<16x1xf32>
    %cst_7 = arith.constant 3.200000e+01 : f32
    %12 = vector.broadcast %cst_7 : f32 to vector<16x1xf32>
    %13 = arith.divf %11, %12 : vector<16x1xf32>
    %14 = vector.broadcast %6 : vector<16x1xf32> to vector<16x32xf32>
    %15 = arith.subf %0, %14 : vector<16x32xf32>
    %cst_8 = arith.constant 9.99999974E-6 : f32
    %16 = vector.broadcast %cst_8 : f32 to vector<16x1xf32>
    %17 = arith.addf %13, %16 : vector<16x1xf32>
    %18 = math.rsqrt %17 : vector<16x1xf32>
    %19 = vector.broadcast %18 : vector<16x1xf32> to vector<16x32xf32>
    %20 = arith.mulf %15, %19 : vector<16x32xf32>
    %21 = vector.broadcast %1 : vector<1x32xf32> to vector<16x32xf32>
    %22 = arith.mulf %20, %21 : vector<16x32xf32>
    %23 = vector.broadcast %2 : vector<1x32xf32> to vector<16x32xf32>
    %24 = arith.addf %22, %23 : vector<16x32xf32>
    %25 = arith.truncf %24 : vector<16x32xf32> to vector<16x32xbf16>
    %c0_9 = arith.constant 0 : index
    %c0_10 = arith.constant 0 : index
    %26 = vector.load %arg4[%c0_9, %c0_10] : memref<32x96xbf16, #tpu.memory_space<vmem>>, vector<32x96xbf16>
    %cst_11 = arith.constant dense<0.000000e+00> : vector<16x96xf32>
    %27 = tpu.matmul %25, %26, %cst_11 {dimension_numbers = #tpu.dot_dimension_numbers<[1], [0], [0], [1], [0, 0, 1, 1], [], []>} : vector<16x32xbf16>, vector<32x96xbf16>, vector<16x96xf32> -> vector<16x96xf32>
    %c0_12 = arith.constant 0 : index
    %c0_13 = arith.constant 0 : index
    %28 = vector.load %arg5[%c0_12, %c0_13] : memref<1x96xf32, #tpu.memory_space<vmem>>, vector<1x96xf32>
    %29 = vector.broadcast %28 : vector<1x96xf32> to vector<16x96xf32>
    %30 = arith.addf %27, %29 : vector<16x96xf32>
    %31 = vector.extract_strided_slice %30 {offsets = [0, 0], sizes = [16, 8], strides = [1, 1]} : vector<16x96xf32> to vector<16x8xf32>
    %32 = vector.shape_cast %31 : vector<16x8xf32> to vector<2x8x8xf32>
    %33 = vector.extract_strided_slice %30 {offsets = [0, 8], sizes = [16, 8], strides = [1, 1]} : vector<16x96xf32> to vector<16x8xf32>
    %34 = vector.shape_cast %33 : vector<16x8xf32> to vector<2x8x8xf32>
    %35 = vector.extract_strided_slice %30 {offsets = [0, 16], sizes = [16, 8], strides = [1, 1]} : vector<16x96xf32> to vector<16x8xf32>
    %36 = vector.shape_cast %35 : vector<16x8xf32> to vector<2x8x8xf32>
    %37 = vector.extract_strided_slice %30 {offsets = [0, 24], sizes = [16, 8], strides = [1, 1]} : vector<16x96xf32> to vector<16x8xf32>
    %38 = vector.shape_cast %37 : vector<16x8xf32> to vector<2x8x8xf32>
    %39 = tpu.concatenate %32, %34, %36, %38 in 0 : vector<2x8x8xf32>, vector<2x8x8xf32>, vector<2x8x8xf32>, vector<2x8x8xf32> -> vector<8x8x8xf32>
    %40 = vector.extract_strided_slice %30 {offsets = [0, 32], sizes = [16, 8], strides = [1, 1]} : vector<16x96xf32> to vector<16x8xf32>
    %41 = vector.shape_cast %40 : vector<16x8xf32> to vector<2x8x8xf32>
    %42 = vector.extract_strided_slice %30 {offsets = [0, 40], sizes = [16, 8], strides = [1, 1]} : vector<16x96xf32> to vector<16x8xf32>
    %43 = vector.shape_cast %42 : vector<16x8xf32> to vector<2x8x8xf32>
    %44 = vector.extract_strided_slice %30 {offsets = [0, 48], sizes = [16, 8], strides = [1, 1]} : vector<16x96xf32> to vector<16x8xf32>
    %45 = vector.shape_cast %44 : vector<16x8xf32> to vector<2x8x8xf32>
    %46 = vector.extract_strided_slice %30 {offsets = [0, 56], sizes = [16, 8], strides = [1, 1]} : vector<16x96xf32> to vector<16x8xf32>
    %47 = vector.shape_cast %46 : vector<16x8xf32> to vector<2x8x8xf32>
    %48 = tpu.concatenate %41, %43, %45, %47 in 0 : vector<2x8x8xf32>, vector<2x8x8xf32>, vector<2x8x8xf32>, vector<2x8x8xf32> -> vector<8x8x8xf32>
    %49 = vector.extract_strided_slice %30 {offsets = [0, 64], sizes = [16, 8], strides = [1, 1]} : vector<16x96xf32> to vector<16x8xf32>
    %50 = vector.shape_cast %49 : vector<16x8xf32> to vector<2x8x8xf32>
    %51 = vector.extract_strided_slice %30 {offsets = [0, 72], sizes = [16, 8], strides = [1, 1]} : vector<16x96xf32> to vector<16x8xf32>
    %52 = vector.shape_cast %51 : vector<16x8xf32> to vector<2x8x8xf32>
    %53 = vector.extract_strided_slice %30 {offsets = [0, 80], sizes = [16, 8], strides = [1, 1]} : vector<16x96xf32> to vector<16x8xf32>
    %54 = vector.shape_cast %53 : vector<16x8xf32> to vector<2x8x8xf32>
    %55 = vector.extract_strided_slice %30 {offsets = [0, 88], sizes = [16, 8], strides = [1, 1]} : vector<16x96xf32> to vector<16x8xf32>
    %56 = vector.shape_cast %55 : vector<16x8xf32> to vector<2x8x8xf32>
    %57 = tpu.concatenate %50, %52, %54, %56 in 0 : vector<2x8x8xf32>, vector<2x8x8xf32>, vector<2x8x8xf32>, vector<2x8x8xf32> -> vector<8x8x8xf32>
    %58 = tpu.iota {dimensions = array<i32: 1>} : vector<8x8x8xi32>
    %59 = tpu.iota {dimensions = array<i32: 2>} : vector<8x8x8xi32>
    %60 = arith.cmpi sge, %58, %59 : vector<8x8x8xi32>
    %cst_14 = arith.constant 0.000000e+00 : f32
    %cst_15 = arith.constant -1.000000e+30 : f32
    %61 = vector.broadcast %cst_14 : f32 to vector<8x8x8xf32>
    %62 = vector.broadcast %cst_15 : f32 to vector<8x8x8xf32>
    %63 = arith.select %60, %61, %62 : vector<8x8x8xi1>, vector<8x8x8xf32>
    "tpu.trace_start"() <{level = 10 : i32, message = "gtd,gsd->gts"}> : () -> ()
    %cst_16 = arith.constant dense<0.000000e+00> : vector<8x8x8xf32>
    %64 = tpu.matmul %39, %48, %cst_16 {dimension_numbers = #tpu.dot_dimension_numbers<[2], [2], [1], [1], [0, 0, 0, 1, 1, 1], [0], [0]>} : vector<8x8x8xf32>, vector<8x8x8xf32>, vector<8x8x8xf32> -> vector<8x8x8xf32>
    "tpu.trace_stop"() : () -> ()
    %65 = arith.addf %64, %63 : vector<8x8x8xf32>
    %cst_17 = arith.constant dense<0xFF800000> : vector<8x8xf32>
    %66 = vector.multi_reduction <maximumf>, %65, %cst_17 [2] : vector<8x8x8xf32> to vector<8x8xf32>
    %67 = vector.shape_cast %66 : vector<8x8xf32> to vector<8x8x1xf32>
    %68 = vector.broadcast %67 : vector<8x8x1xf32> to vector<8x8x8xf32>
    %69 = arith.subf %65, %68 : vector<8x8x8xf32>
    %70 = math.exp %69 : vector<8x8x8xf32>
    %cst_18 = arith.constant dense<0.000000e+00> : vector<8x8xf32>
    %71 = vector.multi_reduction <add>, %70, %cst_18 [2] : vector<8x8x8xf32> to vector<8x8xf32>
    %72 = vector.shape_cast %71 : vector<8x8xf32> to vector<8x8x1xf32>
    %73 = tpu.reciprocal %72 {approx = true} : vector<8x8x1xf32> -> vector<8x8x1xf32>
    %74 = vector.broadcast %73 : vector<8x8x1xf32> to vector<8x8x8xf32>
    %75 = arith.mulf %70, %74 : vector<8x8x8xf32>
    "tpu.trace_start"() <{level = 10 : i32, message = "gts,gsd->gtd"}> : () -> ()
    %cst_19 = arith.constant dense<0.000000e+00> : vector<8x8x8xf32>
    %76 = tpu.matmul %75, %57, %cst_19 {dimension_numbers = #tpu.dot_dimension_numbers<[2], [1], [1], [2], [0, 0, 0, 1, 1, 2], [0], [0]>} : vector<8x8x8xf32>, vector<8x8x8xf32>, vector<8x8x8xf32> -> vector<8x8x8xf32>
    "tpu.trace_stop"() : () -> ()
    %77 = vector.shape_cast %76 : vector<8x8x8xf32> to vector<4x16x8xf32>
    %78 = arith.truncf %77 : vector<4x16x8xf32> to vector<4x16x8xbf16>
    %c0_20 = arith.constant 0 : index
    %c0_21 = arith.constant 0 : index
    %c0_22 = arith.constant 0 : index
    %79 = vector.load %arg6[%c0_20, %c0_21, %c0_22] : memref<4x8x32xbf16, #tpu.memory_space<vmem>>, vector<4x8x32xbf16>
    "tpu.trace_start"() <{level = 10 : i32, message = "hrd,hdc->hrc"}> : () -> ()
    %cst_23 = arith.constant dense<0.000000e+00> : vector<4x16x32xf32>
    %80 = tpu.matmul %78, %79, %cst_23 {dimension_numbers = #tpu.dot_dimension_numbers<[2], [1], [1], [2], [0, 0, 0, 1, 1, 2], [0], [0]>} : vector<4x16x8xbf16>, vector<4x8x32xbf16>, vector<4x16x32xf32> -> vector<4x16x32xf32>
    "tpu.trace_stop"() : () -> ()
    %cst_24 = arith.constant dense<0.000000e+00> : vector<16x32xf32>
    %81 = vector.multi_reduction <add>, %80, %cst_24 [0] : vector<4x16x32xf32> to vector<16x32xf32>
    %82 = arith.addf %0, %81 : vector<16x32xf32>
    %c0_25 = arith.constant 0 : index
    %c0_26 = arith.constant 0 : index
    %83 = vector.load %arg7[%c0_25, %c0_26] : memref<1x32xf32, #tpu.memory_space<vmem>>, vector<1x32xf32>
    %84 = vector.broadcast %83 : vector<1x32xf32> to vector<16x32xf32>
    %85 = arith.addf %82, %84 : vector<16x32xf32>
    %c0_27 = arith.constant 0 : index
    %c0_28 = arith.constant 0 : index
    %86 = vector.load %arg8[%c0_27, %c0_28] : memref<1x32xf32, #tpu.memory_space<vmem>>, vector<1x32xf32>
    %c0_29 = arith.constant 0 : index
    %c0_30 = arith.constant 0 : index
    %87 = vector.load %arg9[%c0_29, %c0_30] : memref<1x32xf32, #tpu.memory_space<vmem>>, vector<1x32xf32>
    %cst_31 = arith.constant dense<0.000000e+00> : vector<16xf32>
    %88 = vector.multi_reduction <add>, %85, %cst_31 [1] : vector<16x32xf32> to vector<16xf32>
    %89 = vector.shape_cast %88 : vector<16xf32> to vector<16x1xf32>
    %cst_32 = arith.constant 3.200000e+01 : f32
    %90 = vector.broadcast %cst_32 : f32 to vector<16x1xf32>
    %91 = arith.divf %89, %90 : vector<16x1xf32>
    %92 = vector.broadcast %91 : vector<16x1xf32> to vector<16x32xf32>
    %93 = arith.subf %85, %92 : vector<16x32xf32>
    %94 = arith.mulf %93, %93 : vector<16x32xf32>
    %cst_33 = arith.constant dense<0.000000e+00> : vector<16xf32>
    %95 = vector.multi_reduction <add>, %94, %cst_33 [1] : vector<16x32xf32> to vector<16xf32>
    %96 = vector.shape_cast %95 : vector<16xf32> to vector<16x1xf32>
    %cst_34 = arith.constant 3.200000e+01 : f32
    %97 = vector.broadcast %cst_34 : f32 to vector<16x1xf32>
    %98 = arith.divf %96, %97 : vector<16x1xf32>
    %99 = vector.broadcast %91 : vector<16x1xf32> to vector<16x32xf32>
    %100 = arith.subf %85, %99 : vector<16x32xf32>
    %cst_35 = arith.constant 9.99999974E-6 : f32
    %101 = vector.broadcast %cst_35 : f32 to vector<16x1xf32>
    %102 = arith.addf %98, %101 : vector<16x1xf32>
    %103 = math.rsqrt %102 : vector<16x1xf32>
    %104 = vector.broadcast %103 : vector<16x1xf32> to vector<16x32xf32>
    %105 = arith.mulf %100, %104 : vector<16x32xf32>
    %106 = vector.broadcast %86 : vector<1x32xf32> to vector<16x32xf32>
    %107 = arith.mulf %105, %106 : vector<16x32xf32>
    %108 = vector.broadcast %87 : vector<1x32xf32> to vector<16x32xf32>
    %109 = arith.addf %107, %108 : vector<16x32xf32>
    %110 = arith.truncf %109 : vector<16x32xf32> to vector<16x32xbf16>
    %c0_36 = arith.constant 0 : index
    %c0_37 = arith.constant 0 : index
    %111 = vector.load %arg10[%c0_36, %c0_37] : memref<32x128xbf16, #tpu.memory_space<vmem>>, vector<32x128xbf16>
    %cst_38 = arith.constant dense<0.000000e+00> : vector<16x128xf32>
    %112 = tpu.matmul %110, %111, %cst_38 {dimension_numbers = #tpu.dot_dimension_numbers<[1], [0], [0], [1], [0, 0, 1, 1], [], []>} : vector<16x32xbf16>, vector<32x128xbf16>, vector<16x128xf32> -> vector<16x128xf32>
    %c0_39 = arith.constant 0 : index
    %c0_40 = arith.constant 0 : index
    %113 = vector.load %arg11[%c0_39, %c0_40] : memref<1x128xf32, #tpu.memory_space<vmem>>, vector<1x128xf32>
    %114 = vector.broadcast %113 : vector<1x128xf32> to vector<16x128xf32>
    %115 = arith.addf %112, %114 : vector<16x128xf32>
    %cst_41 = arith.constant 5.000000e-01 : f32
    %116 = vector.broadcast %cst_41 : f32 to vector<16x128xf32>
    %117 = arith.mulf %116, %115 : vector<16x128xf32>
    %cst_42 = arith.constant 4.471500e-02 : f32
    %118 = vector.broadcast %cst_42 : f32 to vector<16x128xf32>
    %119 = arith.mulf %118, %115 : vector<16x128xf32>
    %120 = arith.mulf %119, %115 : vector<16x128xf32>
    %121 = arith.mulf %120, %115 : vector<16x128xf32>
    %122 = arith.addf %115, %121 : vector<16x128xf32>
    %cst_43 = arith.constant 0.797884583 : f32
    %123 = vector.broadcast %cst_43 : f32 to vector<16x128xf32>
    %124 = arith.mulf %123, %122 : vector<16x128xf32>
    %125 = math.tanh %124 : vector<16x128xf32>
    %cst_44 = arith.constant 1.000000e+00 : f32
    %126 = vector.broadcast %cst_44 : f32 to vector<16x128xf32>
    %127 = arith.addf %126, %125 : vector<16x128xf32>
    %128 = arith.mulf %117, %127 : vector<16x128xf32>
    %129 = arith.truncf %128 : vector<16x128xf32> to vector<16x128xbf16>
    %c0_45 = arith.constant 0 : index
    %c0_46 = arith.constant 0 : index
    %130 = vector.load %arg12[%c0_45, %c0_46] : memref<128x32xbf16, #tpu.memory_space<vmem>>, vector<128x32xbf16>
    %cst_47 = arith.constant dense<0.000000e+00> : vector<16x32xf32>
    %131 = tpu.matmul %129, %130, %cst_47 {dimension_numbers = #tpu.dot_dimension_numbers<[1], [0], [0], [1], [0, 0, 1, 1], [], []>} : vector<16x128xbf16>, vector<128x32xbf16>, vector<16x32xf32> -> vector<16x32xf32>
    %c0_48 = arith.constant 0 : index
    %c0_49 = arith.constant 0 : index
    %132 = vector.load %arg13[%c0_48, %c0_49] : memref<1x32xf32, #tpu.memory_space<vmem>>, vector<1x32xf32>
    %133 = vector.broadcast %132 : vector<1x32xf32> to vector<16x32xf32>
    %134 = arith.addf %131, %133 : vector<16x32xf32>
    %135 = arith.addf %85, %134 : vector<16x32xf32>
    %c0_50 = arith.constant 0 : index
    %c0_51 = arith.constant 0 : index
    %136 = vector.load %arg14[%c0_50, %c0_51] : memref<16x32xf32, #tpu.memory_space<vmem>>, vector<16x32xf32>
    tpu.vector_store %arg14[%c0_50, %c0_51], %135 {strides = array<i32>} : memref<16x32xf32, #tpu.memory_space<vmem>>, vector<16x32xf32>,
    return
  }
  func.func @transform_0(%arg0: i32) -> (i32, i32) {
    %c0_i32 = arith.constant 0 : i32
    %c0_i32_0 = arith.constant 0 : i32
    %c0_i32_1 = arith.constant 0 : i32
    return %c0_i32, %c0_i32_0 : i32, i32
  }
  func.func @transform_1(%arg0: i32) -> (i32, i32) {
    %c0_i32 = arith.constant 0 : i32
    %c0_i32_0 = arith.constant 0 : i32
    %c0_i32_1 = arith.constant 0 : i32
    return %c0_i32, %c0_i32_0 : i32, i32
  }
  func.func @transform_2(%arg0: i32) -> (i32, i32) {
    %c0_i32 = arith.constant 0 : i32
    %c0_i32_0 = arith.constant 0 : i32
    %c0_i32_1 = arith.constant 0 : i32
    return %c0_i32, %c0_i32_0 : i32, i32
  }
  func.func @transform_3(%arg0: i32) -> (i32, i32) {
    %c0_i32 = arith.constant 0 : i32
    %c0_i32_0 = arith.constant 0 : i32
    %c0_i32_1 = arith.constant 0 : i32
    return %c0_i32, %c0_i32_0 : i32, i32
  }
  func.func @transform_4(%arg0: i32) -> (i32, i32) {
    %c0_i32 = arith.constant 0 : i32
    %c0_i32_0 = arith.constant 0 : i32
    %c0_i32_1 = arith.constant 0 : i32
    return %c0_i32, %c0_i32_0 : i32, i32
  }
  func.func @transform_5(%arg0: i32) -> (i32, i32, i32) {
    %c0_i32 = arith.constant 0 : i32
    %c0_i32_0 = arith.constant 0 : i32
    %c0_i32_1 = arith.constant 0 : i32
    %c0_i32_2 = arith.constant 0 : i32
    return %c0_i32, %c0_i32_0, %c0_i32_1 : i32, i32, i32
  }
  func.func @transform_6(%arg0: i32) -> (i32, i32) {
    %c0_i32 = arith.constant 0 : i32
    %c0_i32_0 = arith.constant 0 : i32
    %c0_i32_1 = arith.constant 0 : i32
    return %c0_i32, %c0_i32_0 : i32, i32
  }
  func.func @transform_7(%arg0: i32) -> (i32, i32) {
    %c0_i32 = arith.constant 0 : i32
    %c0_i32_0 = arith.constant 0 : i32
    %c0_i32_1 = arith.constant 0 : i32
    return %c0_i32, %c0_i32_0 : i32, i32
  }
  func.func @transform_8(%arg0: i32) -> (i32, i32) {
    %c0_i32 = arith.constant 0 : i32
    %c0_i32_0 = arith.constant 0 : i32
    %c0_i32_1 = arith.constant 0 : i32
    return %c0_i32, %c0_i32_0 : i32, i32
  }
  func.func @transform_9(%arg0: i32) -> (i32, i32) {
    %c0_i32 = arith.constant 0 : i32
    %c0_i32_0 = arith.constant 0 : i32
    %c0_i32_1 = arith.constant 0 : i32
    return %c0_i32, %c0_i32_0 : i32, i32
  }
  func.func @transform_10(%arg0: i32) -> (i32, i32) {
    %c0_i32 = arith.constant 0 : i32
    %c0_i32_0 = arith.constant 0 : i32
    %c0_i32_1 = arith.constant 0 : i32
    return %c0_i32, %c0_i32_0 : i32, i32
  }
  func.func @transform_11(%arg0: i32) -> (i32, i32) {
    %c0_i32 = arith.constant 0 : i32
    %c0_i32_0 = arith.constant 0 : i32
    %c0_i32_1 = arith.constant 0 : i32
    return %c0_i32, %c0_i32_0 : i32, i32
  }
  func.func @transform_12(%arg0: i32) -> (i32, i32) {
    %c0_i32 = arith.constant 0 : i32
    %c0_i32_0 = arith.constant 0 : i32
    %c0_i32_1 = arith.constant 0 : i32
    return %c0_i32, %c0_i32_0 : i32, i32
  }
  func.func @transform_13(%arg0: i32) -> (i32, i32) {
    %c0_i32 = arith.constant 0 : i32
    %c0_i32_0 = arith.constant 0 : i32
    %c0_i32_1 = arith.constant 0 : i32
    return %c0_i32, %c0_i32_0 : i32, i32
  }
}

</mosaic_0001>

<bundles_post_ra>
// kernel: gpt2_block.1
= control target key start
LH: loop header
LB: loop body
LE: loop exit
PB: predicated region body
PF: predicated region fallthrough
CT: control target
= control target key end

     0   :  { %vm50_vm0 = vcmask 261120   ;;  %s2715_s0 = inlined_call_operand.vmem [shape: f32[16,32], index: 0, kind: input, shape index: {}]   ;;  %s2716_s1 = inlined_call_operand.vmem [shape: f32[1,32], index: 1, kind: input, shape index: {}]   ;;  %s2717_s2 = inlined_call_operand.vmem [shape: f32[1,32], index: 2, kind: input, shape index: {}]   ;;  %s2718_s3 = inlined_call_operand.vmem [shape: bf16[32,96], index: 3, kind: input, shape index: {}]   ;;  %s2719_s4 = inlined_call_operand.vmem [shape: f32[1,96], index: 4, kind: input, shape index: {}]   ;;  %s2720_s5 = inlined_call_operand.vmem [shape: bf16[4,8,32], index: 5, kind: input, shape index: {}]   ;;  %s2721_s6 = inlined_call_operand.vmem [shape: f32[1,32], index: 6, kind: input, shape index: {}]   ;;  %s2722_s7 = inlined_call_operand.vmem [shape: f32[1,32], index: 7, kind: input, shape index: {}]   ;;  %s2723_s8 = inlined_call_operand.vmem [shape: f32[1,32], index: 8, kind: input, shape index: {}]   ;;  %s2724_s9 = inlined_call_operand.vmem [shape: bf16[32,128], index: 9, kind: input, shape index: {}]   ;;  %s2725_s10 = inlined_call_operand.vmem [shape: f32[1,128], index: 10, kind: input, shape index: {}]   ;;  %s2726_s11 = inlined_call_operand.vmem [shape: bf16[128,32], index: 11, kind: input, shape index: {}]   ;;  %s2727_s12 = inlined_call_operand.vmem [shape: f32[1,32], index: 12, kind: input, shape index: {}]   ;;  %s2728_s13 = inlined_call_operand.hbm [shape: f32[16,32], index: 13, kind: output, shape index: {}]  }
   0x1   :  { %v2392_v0 = vld [vmem:[%s2715_s0] sm:$0xff]  ;;  %v2397_v1 = vld [vmem:[%s2715_s0 + $0x8] sm:$0xff] }
   0x2   :  { %v51_v2 = vsel %vm50_vm0, %v2392_v0, 0.0  ;;  %v54_v3 = vsel %vm50_vm0, %v2397_v1, 0.0 }
   0x3   :  { %52 = vadd.xlane.f32.xlu0 %v51_v2 }
   0x7   :  { %55 = vadd.xlane.f32.xlu0 %v54_v3 }
   0x8   :  { %18 = vsyncpa [#allocation3], 0  ;;  %v2228_v14 = vld [vmem:[%s2718_s3] sm:$0xff]   ;;  %v2308_v15 = vmov 0.0   ;;  %v2229_v16 = vld [vmem:[%s2718_s3 + $0x8] sm:$0xff]   ;;  %vm2309_vm1 = vmmov 0   ;;  %v176_v55 = vlaneseq }
   0x9   :  { %2077 = vmatprep.subr.bf16.mxu1 %v2308_v15  ;;  %2100 = vmatprep.subr.mxu0 %v2308_v15  ;;  %v1972_v25 = vld [vmem:[%s2716_s1] ss:$0 sm:$0xff]  ;;  %s2310_s1 = smov 112   ;;  %s2312_s20 = smov 104   ;;  %vm184_vm2 = vcmask 64512   ;;  %vm1498_vm4 = vcmask 1043456  }
   0xa   :  { %2078 = vmatpush3.bf16.msra.mxu1 %v2228_v14  ;;  %2081 = vmatprep.mubr.msk.bf16.mxu1 %vm2309_vm1, %v2308_v15  ;;  %v1973_v29 = vld [vmem:[%s2717_s2] ss:$0 sm:$0xff]  ;;  %s2311_s2 = smov 120   ;;  %v177_v56 = vshrl.u32 %v176_v55, 7  ;;  %v179_v57 = vand.u32 127, %v176_v55  ;;  %s2315_s21 = smov 64  }
   0xb   :  { %2079 = vmatprep.subr.bf16.mxu1 %v2308_v15  ;;  %2102 = vmatprep.mubr.msk.f32.mxu0 %vm2309_vm1, %v2308_v15  ;;  %v1974_v34 = vld [vmem:[%s2719_s4] ss:$0 sm:$0xff]  ;;  %s2313_s4 = smov 96   ;;  %v2314_v58 = vmov -1e+30   ;;  %s2316_s29 = smov [#allocation2]  }
   0xc   :  { %vm180_vm3 = vcmp.ge.s32.totalorder %v177_v56, %v179_v57 }
   0xd   :  { %v181_v59 = vsel %vm180_vm3, 0.0, %v2314_v58 }
   0xe   :  { %2080 = vmatpush3.bf16.msra.mxu1 %v2229_v16 }
   0xf   :  { %2085 = vmatprep.subr.mxu1 %v2308_v15 }
  0x90   :  { %v53_v4 = vpop.xlane.xlu0 %52 }
  0x91   :  { %v58_v5 = vmul.f32 0.03125, %v53_v4 }
  0x93   :  { %v60_v6 = vsub.f32 %v2392_v0, %v58_v5 }
  0x94   :  { %v56_v7 = vpop.xlane.xlu0 %55 }
  0x95   :  { %v59_v8 = vmul.f32 0.03125, %v56_v7  ;;  %v62_v9 = vmul.f32 %v60_v6, %v60_v6 }
  0x97   :  { %v61_v10 = vsub.f32 %v2397_v1, %v59_v8  ;;  %v64_v11 = vsel %vm50_vm0, %v62_v9, 0.0 }
  0x98   :  { %65 = vadd.xlane.f32.xlu1 %v64_v11 }
  0x99   :  { %v63_v12 = vmul.f32 %v61_v10, %v61_v10 }
  0x9b   :  { %v67_v13 = vsel %vm50_vm0, %v63_v12, 0.0 }
  0x9c   :  { %68 = vadd.xlane.f32.xlu1 %v67_v13 }
 0x125   :  { %v66_v17 = vpop.xlane.xlu1 %65 }
 0x126   :  { %v70_v18 = vmul.f32 0.03125, %v66_v17 }
 0x128   :  { %v72_v19 = vadd.f32 1e-05, %v70_v18 }
 0x129   :  { %v69_v20 = vpop.xlane.xlu1 %68 }
 0x12a   :  { %2240 = vrsqrt.f32 %v72_v19  ;;  %v71_v21 = vmul.f32 0.03125, %v69_v20 }
 0x12c   :  { %v73_v22 = vadd.f32 1e-05, %v71_v21 }
 0x12e   :  { %2242 = vrsqrt.f32 %v73_v22 }
 0x134   :  { %v2241_v23 = vpop.eup %2240 }
 0x135   :  { %v76_v24 = vmul.f32 %v2241_v23, %v60_v6 }
 0x137   :  { %v84_v28 = vmul.f32 %v1972_v25, %v76_v24 }
 0x138   :  { %v2243_v26 = vpop.eup %2242 }
 0x139   :  { %v77_v27 = vmul.f32 %v2243_v26, %v61_v10  ;;  %v92_v31 = vadd.f32 %v1973_v29, %v84_v28 }
 0x13b   :  { %v85_v30 = vmul.f32 %v1972_v25, %v77_v27 }
 0x13d   :  { %v93_v32 = vadd.f32 %v1973_v29, %v85_v30 }
 0x13f   :  { %v94_v33 = vpack.c.bf16 %v93_v32, %v92_v31 }
 0x141   :  { %2082 = vmatmul.mubr.msk.bf16.vlgmr.msra.gmra.mrb[0].mxu1 %vm50_vm0, %v94_v33 }
 0x142   :  { %2087 = vmatprep.mubr.msk.f32.mxu1 %vm2309_vm1, %v2308_v15 }
 0x214   :  { %v155_v35 = vpop.f32.mrb[0].mxu1 }
 0x215   :  { %v2433_v36 = vadd.f32 %v1974_v34, %v155_v35  ;;  %v2083_v37 = vpop.f32.mrb[1].mxu1 }
 0x216   :  { %v158_v38 = vpop.f32.mrb[2].mxu1 }
 0x217   :  { %168 = vrot.lane.b32.xlu1 %v2433_v36, %s2310_s1  ;;  %164 = vrot.lane.b32.xlu0 %v2433_v36, %s2311_s2  ;;  %v2084_v39 = vpop.f32.mrb[3].mxu1  ;;  %v2437_v40 = vadd.f32 %v1974_v34, %v158_v38 }
 0x21b   :  { %172 = vrot.lane.b32.xlu0 %v2433_v36, %s2312_s20  ;;  %166 = vrot.lane.b32.xlu1 %v2437_v40, %s2311_s2 }
 0x21f   :  { %182 = vrot.lane.b32.xlu0 %v2433_v36, %s2313_s4  ;;  %170 = vrot.lane.b32.xlu1 %v2437_v40, %s2310_s1 }
 0x223   :  { %174 = vrot.lane.b32.xlu1 %v2437_v40, %s2312_s20 }
 0x227   :  { %259 = vrot.lane.b32.xlu1 %v2437_v40, %s2313_s4 }
 0x289   :  { %v2445_v41 = vpop.permute.xlu1 %168  ;;  %v2447_v42 = vpop.permute.xlu0 %164 }
 0x28a   :  { %335 = vrot.lane.b32.xlu0 %v2447_v42, %s2313_s4 }
 0x28d   :  { %v2450_v43 = vpop.permute.xlu0 %172  ;;  %v2452_v44 = vpop.permute.xlu1 %166 }
 0x28e   :  { %487 = vrot.lane.b32.xlu0 %v2445_v41, %s2313_s4  ;;  %411 = vrot.lane.b32.xlu1 %v2452_v44, %s2313_s4 }
 0x291   :  { %v183_v45 = vpop.permute.xlu0 %182  ;;  %v2456_v46 = vpop.permute.xlu1 %170 }
 0x292   :  { %639 = vrot.lane.b32.xlu0 %v2450_v43, %s2313_s4  ;;  %2086 = vmatpush3.xpose.msk.msra.mxu1 %vm184_vm2, %v183_v45 }
 0x293   :  { %563 = vrot.lane.b32.xlu1 %v2456_v46, %s2313_s4  ;;  %2090 = vmatprep.subr.mxu1 %v2308_v15 }
 0x295   :  { %2088 = vmatmul.mubr.msk.f32.vlgmr.msra.gmra.mrb[4].mxu1 %vm184_vm2, %v2433_v36  ;;  %v2464_v47 = vpop.permute.xlu1 %174 }
 0x296   :  { %2092 = vmatprep.mubr.msk.f32.mxu1 %vm2309_vm1, %v2308_v15 }
 0x297   :  { %715 = vrot.lane.b32.xlu1 %v2464_v47, %s2313_s4 }
 0x299   :  { %v260_v48 = vpop.permute.xlu1 %259 }
 0x29a   :  { %2091 = vmatpush3.xpose.msk.msra.mxu1 %vm184_vm2, %v260_v48 }
 0x29b   :  { %2095 = vmatprep.subr.mxu1 %v2308_v15 }
 0x29d   :  { %2093 = vmatmul.mubr.msk.f32.vlgmr.msra.gmra.mrb[6].mxu1 %vm184_vm2, %v2437_v40 }
 0x29e   :  { %2097 = vmatprep.mubr.msk.f32.mxu1 %vm2309_vm1, %v2308_v15 }
 0x2fc   :  { %v336_v49 = vpop.permute.xlu0 %335 }
 0x2fd   :  { %2096 = vmatpush3.xpose.msk.msra.mxu1 %vm184_vm2, %v336_v49 }
 0x2fe   :  { %2105 = vmatprep.subr.mxu1 %v2308_v15 }
 0x300   :  { %v488_v50 = vpop.permute.xlu0 %487  ;;  %2098 = vmatmul.mubr.msk.f32.vlgmr.msra.gmra.mrb[8].mxu1 %vm184_vm2, %v2447_v42  ;;  %v412_v51 = vpop.permute.xlu1 %411 }
 0x301   :  { %2101 = vmatpush3.xpose.msk.msra.mxu0 %vm184_vm2, %v412_v51  ;;  %2106 = vmatpush3.xpose.msk.msra.mxu1 %vm184_vm2, %v488_v50 }
 0x302   :  { %2107 = vmatprep.mubr.msk.f32.mxu1 %vm2309_vm1, %v2308_v15  ;;  %2110 = vmatprep.subr.mxu0 %v2308_v15 }
 0x303   :  { %2115 = vmatprep.subr.mxu1 %v2308_v15 }
 0x304   :  { %v640_v52 = vpop.permute.xlu0 %639  ;;  %2103 = vmatmul.mubr.msk.f32.vlgmr.msra.gmra.mrb[0].mxu0 %vm184_vm2, %v2452_v44  ;;  %2108 = vmatmul.mubr.msk.f32.vlgmr.msra.gmra.mrb[10].mxu1 %vm184_vm2, %v2445_v41 }
 0x305   :  { %v564_v53 = vpop.permute.xlu1 %563  ;;  %2116 = vmatpush3.xpose.msk.msra.mxu1 %vm184_vm2, %v640_v52  ;;  %2112 = vmatprep.mubr.msk.f32.mxu0 %vm2309_vm1, %v2308_v15 }
 0x306   :  { %2111 = vmatpush3.xpose.msk.msra.mxu0 %vm184_vm2, %v564_v53  ;;  %2117 = vmatprep.mubr.msk.f32.mxu1 %vm2309_vm1, %v2308_v15 }
 0x307   :  { %2120 = vmatprep.subr.mxu0 %v2308_v15  ;;  %2125 = vmatprep.subr.mxu1 %v2308_v15 }
 0x308   :  { %2118 = vmatmul.mubr.msk.f32.vlgmr.msra.gmra.mrb[12].mxu1 %vm184_vm2, %v2450_v43 }
 0x309   :  { %2113 = vmatmul.mubr.msk.f32.vlgmr.msra.gmra.mrb[2].mxu0 %vm184_vm2, %v2456_v46  ;;  %v716_v54 = vpop.permute.xlu1 %715  ;;  %2127 = vmatprep.mubr.msk.f32.mxu1 %vm2309_vm1, %v2308_v15 }
 0x30a   :  { %2121 = vmatpush3.xpose.msk.msra.mxu0 %vm184_vm2, %v716_v54  ;;  %2122 = vmatprep.mubr.msk.f32.mxu0 %vm2309_vm1, %v2308_v15 }
 0x30b   :  { %2130 = vmatprep.subr.mxu0 %v2308_v15 }
 0x30d   :  { %2123 = vmatmul.mubr.msk.f32.vlgmr.msra.gmra.mrb[4].mxu0 %vm184_vm2, %v2464_v47 }
 0x30e   :  { %2132 = vmatprep.mubr.msk.f32.mxu0 %vm2309_vm1, %v2308_v15 }
 0x368   :  { %v255_v60 = vpop.f32.mrb[4].mxu1 }
 0x369   :  { %v256_v61 = vadd.f32 %v255_v60, %v181_v59  ;;  %v2089_v62 = vpop.f32.mrb[5].mxu1 }
 0x36b   :  { %v791_v63 = vsel %vm184_vm2, %v256_v61, -inf }
 0x36c   :  { %792 = vmax.xlane.f32.xlu0 %v791_v63 }
 0x370   :  { %v331_v2 = vpop.f32.mrb[6].mxu1 }
 0x371   :  { %v332_v3 = vadd.f32 %v331_v2, %v181_v59  ;;  %v2094_v4 = vpop.f32.mrb[7].mxu1 }
 0x373   :  { %v794_v5 = vsel %vm184_vm2, %v332_v3, -inf }
 0x374   :  { %795 = vmax.xlane.f32.xlu1 %v794_v5 }
 0x3d3   :  { %v407_v6 = vpop.f32.mrb[8].mxu1 }
 0x3d4   :  { %v408_v7 = vadd.f32 %v407_v6, %v181_v59  ;;  %v2099_v8 = vpop.f32.mrb[9].mxu1 }
 0x3d6   :  { %v797_v9 = vsel %vm184_vm2, %v408_v7, -inf }
 0x3d7   :  { %v483_v10 = vpop.f32.mrb[0].mxu0  ;;  %798 = vmax.xlane.f32.xlu0 %v797_v9  ;;  %v559_v11 = vpop.f32.mrb[10].mxu1 }
 0x3d8   :  { %v484_v12 = vadd.f32 %v483_v10, %v181_v59  ;;  %v2104_v13 = vpop.f32.mrb[1].mxu0  ;;  %v2109_v14 = vpop.f32.mrb[11].mxu1  ;;  %v560_v16 = vadd.f32 %v559_v11, %v181_v59 }
 0x3da   :  { %v800_v17 = vsel %vm184_vm2, %v484_v12, -inf  ;;  %v803_v24 = vsel %vm184_vm2, %v560_v16, -inf }
 0x3db   :  { %801 = vmax.xlane.f32.xlu0 %v800_v17  ;;  %v711_v18 = vpop.f32.mrb[12].mxu1 }
 0x3dc   :  { %v635_v19 = vpop.f32.mrb[2].mxu0  ;;  %v2119_v20 = vpop.f32.mrb[13].mxu1  ;;  %v712_v23 = vadd.f32 %v711_v18, %v181_v59 }
 0x3dd   :  { %v636_v21 = vadd.f32 %v635_v19, %v181_v59  ;;  %v2114_v22 = vpop.f32.mrb[3].mxu0 }
 0x3de   :  { %v809_v29 = vsel %vm184_vm2, %v712_v23, -inf }
 0x3df   :  { %v806_v25 = vsel %vm184_vm2, %v636_v21, -inf  ;;  %804 = vmax.xlane.f32.xlu0 %v803_v24 }
 0x3e0   :  { %v787_v26 = vpop.f32.mrb[4].mxu0  ;;  %807 = vmax.xlane.f32.xlu1 %v806_v25 }
 0x3e1   :  { %v788_v27 = vadd.f32 %v787_v26, %v181_v59  ;;  %v2124_v28 = vpop.f32.mrb[5].mxu0 }
 0x3e3   :  { %v812_v30 = vsel %vm184_vm2, %v788_v27, -inf  ;;  %810 = vmax.xlane.f32.xlu0 %v809_v29 }
 0x3e4   :  { %813 = vmax.xlane.f32.xlu1 %v812_v30 }
 0x3f5   :  { %955 = vrot.lane.b32.xlu1 %v2437_v40, %s2315_s21 }
 0x3f9   :  { %1031 = vrot.lane.b32.xlu1 %v2447_v42, %s2315_s21  ;;  %879 = vrot.lane.b32.xlu0 %v2433_v36, %s2315_s21  ;;  %v793_v31 = vpop.xlane.xlu0 %792 }
 0x3fa   :  { %v815_v32 = vsub.f32 %v256_v61, %v793_v31 }
 0x3fc   :  { %v823_v33 = vmul.f32 1.442695, %v815_v32 }
 0x3fd   :  { %1107 = vrot.lane.b32.xlu1 %v2452_v44, %s2315_s21  ;;  %1183 = vrot.lane.b32.xlu0 %v2445_v41, %s2315_s21 }
 0x3fe   :  { %2244 = vpow2.f32 %v823_v33 }
 0x401   :  { %1259 = vrot.lane.b32.xlu1 %v2456_v46, %s2315_s21  ;;  %v796_v34 = vpop.xlane.xlu1 %795 }
 0x402   :  { %v816_v35 = vsub.f32 %v332_v3, %v796_v34 }
 0x404   :  { %v825_v37 = vmul.f32 1.442695, %v816_v35 }
 0x406   :  { %2246 = vpow2.f32 %v825_v37  ;;  %v1491_v37 = vld [vmem:[%s2720_s5] sm:$0xf] }
 0x408   :  { %v2531_v38 = vpop.eup %2244 }
 0x409   :  { %v839_v36 = vsel %vm184_vm2, %v2531_v38, 0.0 }
 0x410   :  { %v2535_v39 = vpop.eup %2246 }
 0x411   :  { %v842_v40 = vsel %vm184_vm2, %v2535_v39, 0.0 }
 0x41c   :  { %840 = vadd.xlane.f32.xlu0 %v839_v36 }
 0x425   :  { %843 = vadd.xlane.f32.xlu1 %v842_v40 }
 0x464   :  { %v799_v41 = vpop.xlane.xlu0 %798 }
 0x465   :  { %v817_v42 = vsub.f32 %v408_v7, %v799_v41 }
 0x467   :  { %v827_v44 = vmul.f32 1.442695, %v817_v42  ;;  %v1500_v42 = vsel %vm1498_vm4, %v1491_v37, 0 }
 0x468   :  { %v802_v45 = vpop.xlane.xlu0 %801 }
 0x469   :  { %2248 = vpow2.f32 %v827_v44  ;;  %v818_v46 = vsub.f32 %v484_v12, %v802_v45  ;;  %v1492_v45 = vld [vmem:[%s2720_s5 + $0x4] sm:$0xf] }
 0x46b   :  { %v829_v48 = vmul.f32 1.442695, %v818_v46  ;;  %v1547_v46 = vsel %vm1498_vm4, %v1492_v45, 0 }
 0x46c   :  { %v805_v49 = vpop.xlane.xlu0 %804 }
 0x46d   :  { %2250 = vpow2.f32 %v829_v48  ;;  %v808_v50 = vpop.xlane.xlu1 %807  ;;  %v819_v51 = vsub.f32 %v560_v16, %v805_v49 }
 0x46e   :  { %v820_v52 = vsub.f32 %v636_v21, %v808_v50  ;;  %v1493_v50 = vld [vmem:[%s2720_s5 + $0x8] sm:$0xf] }
 0x46f   :  { %v831_v53 = vmul.f32 1.442695, %v819_v51 }
 0x470   :  { %v833_v54 = vmul.f32 1.442695, %v820_v52  ;;  %v811_v55 = vpop.xlane.xlu0 %810 }
 0x471   :  { %2252 = vpow2.f32 %v831_v53  ;;  %v814_v56 = vpop.xlane.xlu1 %813  ;;  %v821_v57 = vsub.f32 %v712_v23, %v811_v55 }
 0x472   :  { %2254 = vpow2.f32 %v833_v54  ;;  %v822_v58 = vsub.f32 %v788_v27, %v814_v56  ;;  %v1594_v54 = vsel %vm1498_vm4, %v1493_v50, 0 }
 0x473   :  { %v2249_v59 = vpop.eup %2248  ;;  %v835_v60 = vmul.f32 1.442695, %v821_v57  ;;  %v1494_v57 = vld [vmem:[%s2720_s5 + $0xc] sm:$0xf] }
 0x474   :  { %v837_v61 = vmul.f32 1.442695, %v822_v58  ;;  %v880_v62 = vpop.permute.xlu0 %879  ;;  %v845_v63 = vsel %vm184_vm2, %v2249_v59, 0.0 }
 0x475   :  { %2256 = vpow2.f32 %v835_v60  ;;  %v956_v2 = vpop.permute.xlu1 %955  ;;  %846 = vadd.xlane.f32.xlu0 %v845_v63  ;;  %2126 = vmatpush3.msra.mxu1 %v880_v62 }
 0x476   :  { %2258 = vpow2.f32 %v837_v61  ;;  %2131 = vmatpush3.msra.mxu0 %v956_v2  ;;  %2135 = vmatprep.subr.mxu1 %v2308_v15  ;;  %v1641_v61 = vsel %vm1498_vm4, %v1494_v57, 0  ;;  %v2231_v57 = vld [vmem:[%s2724_s9 + $0x8] sm:$0xff]  }
 0x477   :  { %v2251_v3 = vpop.eup %2250  ;;  %2140 = vmatprep.subr.mxu0 %v2308_v15 }
 0x478   :  { %v848_v4 = vsel %vm184_vm2, %v2251_v3, 0.0  ;;  %v1184_v14 = vpop.permute.xlu0 %1183 }
 0x479   :  { %849 = vadd.xlane.f32.xlu1 %v848_v4  ;;  %v1032_v13 = vpop.permute.xlu1 %1031 }
 0x47b   :  { %v2253_v5 = vpop.eup %2252 }
 0x47c   :  { %v2255_v6 = vpop.eup %2254  ;;  %v851_v7 = vsel %vm184_vm2, %v2253_v5, 0.0 }
 0x47d   :  { %v854_v8 = vsel %vm184_vm2, %v2255_v6, 0.0  ;;  %852 = vadd.xlane.f32.xlu0 %v851_v7  ;;  %v1108_v16 = vpop.permute.xlu1 %1107 }
 0x47e   :  { %855 = vadd.xlane.f32.xlu1 %v854_v8 }
 0x47f   :  { %v2545_v9 = vpop.eup %2256 }
 0x480   :  { %v2547_v10 = vpop.eup %2258  ;;  %v857_v11 = vsel %vm184_vm2, %v2545_v9, 0.0 }
 0x481   :  { %v860_v12 = vsel %vm184_vm2, %v2547_v10, 0.0  ;;  %858 = vadd.xlane.f32.xlu0 %v857_v11  ;;  %v1260_v18 = vpop.permute.xlu1 %1259 }
 0x482   :  { %861 = vadd.xlane.f32.xlu1 %v860_v12 }
 0x493   :  { %1411 = vrot.lane.b32.xlu1 %v2464_v47, %s2315_s21 }
 0x497   :  { %1335 = vrot.lane.b32.xlu0 %v2450_v43, %s2315_s21 }
 0x4a9   :  { %v841_v17 = vpop.xlane.xlu0 %840 }
 0x4aa   :  { %2260 = vrcp.f32 %v841_v17 }
 0x4b2   :  { %v844_v19 = vpop.xlane.xlu1 %843 }
 0x4b3   :  { %2262 = vrcp.f32 %v844_v19 }
 0x4b4   :  { %v2261_v20 = vpop.eup %2260 }
 0x4b5   :  { %v871_v21 = vmul.f32 %v2261_v20, %v2531_v38 }
 0x4b7   :  { %2128 = vmatmul.mubr.msk.f32.vlgmr.msra.gmra.mrb[14].mxu1 %vm184_vm2, %v871_v21 }
 0x4b8   :  { %2136 = vmatpush3.msra.mxu1 %v1032_v13  ;;  %2137 = vmatprep.mubr.msk.f32.mxu1 %vm2309_vm1, %v2308_v15 }
 0x4b9   :  { %2145 = vmatprep.subr.mxu1 %v2308_v15 }
 0x4bd   :  { %v2263_v43 = vpop.eup %2262 }
 0x4be   :  { %v872_v47 = vmul.f32 %v2263_v43, %v2535_v39 }
 0x4c0   :  { %2133 = vmatmul.mubr.msk.f32.vlgmr.msra.gmra.mrb[6].mxu0 %vm184_vm2, %v872_v47 }
 0x4c1   :  { %2141 = vmatpush3.msra.mxu0 %v1108_v16  ;;  %2142 = vmatprep.mubr.msk.f32.mxu0 %vm2309_vm1, %v2308_v15 }
 0x4c2   :  { %2150 = vmatprep.subr.mxu0 %v2308_v15 }
 0x502   :  { %v847_v22 = vpop.xlane.xlu0 %846 }
 0x503   :  { %2264 = vrcp.f32 %v847_v22 }
 0x506   :  { %v850_v23 = vpop.xlane.xlu1 %849 }
 0x507   :  { %2266 = vrcp.f32 %v850_v23 }
 0x50a   :  { %v853_v24 = vpop.xlane.xlu0 %852 }
 0x50b   :  { %v856_v25 = vpop.xlane.xlu1 %855  ;;  %2268 = vrcp.f32 %v853_v24 }
 0x50c   :  { %2270 = vrcp.f32 %v856_v25 }
 0x50d   :  { %v2265_v26 = vpop.eup %2264 }
 0x50e   :  { %v873_v27 = vmul.f32 %v2265_v26, %v2249_v59  ;;  %v859_v28 = vpop.xlane.xlu0 %858 }
 0x50f   :  { %v862_v29 = vpop.xlane.xlu1 %861  ;;  %2272 = vrcp.f32 %v859_v28 }
 0x510   :  { %2274 = vrcp.f32 %v862_v29  ;;  %2138 = vmatmul.mubr.msk.f32.vlgmr.msra.gmra.mrb[16].mxu1 %vm184_vm2, %v873_v27 }
 0x511   :  { %v2267_v30 = vpop.eup %2266  ;;  %2146 = vmatpush3.msra.mxu1 %v1184_v14  ;;  %2147 = vmatprep.mubr.msk.f32.mxu1 %vm2309_vm1, %v2308_v15 }
 0x512   :  { %v874_v31 = vmul.f32 %v2267_v30, %v2251_v3  ;;  %2155 = vmatprep.subr.mxu1 %v2308_v15  ;;  %v1336_v38 = vpop.permute.xlu0 %1335 }
 0x513   :  { %v1412_v39 = vpop.permute.xlu1 %1411 }
 0x514   :  { %2143 = vmatmul.mubr.msk.f32.vlgmr.msra.gmra.mrb[8].mxu0 %vm184_vm2, %v874_v31 }
 0x515   :  { %v2269_v32 = vpop.eup %2268  ;;  %2151 = vmatpush3.msra.mxu0 %v1260_v18  ;;  %2152 = vmatprep.mubr.msk.f32.mxu0 %vm2309_vm1, %v2308_v15 }
 0x516   :  { %v2271_v33 = vpop.eup %2270  ;;  %v875_v34 = vmul.f32 %v2269_v32, %v2253_v5  ;;  %2160 = vmatprep.subr.mxu0 %v2308_v15 }
 0x517   :  { %v876_v35 = vmul.f32 %v2271_v33, %v2255_v6 }
 0x518   :  { %2148 = vmatmul.mubr.msk.f32.vlgmr.msra.gmra.mrb[18].mxu1 %vm184_vm2, %v875_v34 }
 0x519   :  { %v2273_v36 = vpop.eup %2272  ;;  %2153 = vmatmul.mubr.msk.f32.vlgmr.msra.gmra.mrb[10].mxu0 %vm184_vm2, %v876_v35  ;;  %2156 = vmatpush3.msra.mxu1 %v1336_v38 }
 0x51a   :  { %v2275_v40 = vpop.eup %2274  ;;  %v877_v41 = vmul.f32 %v2273_v36, %v2545_v9  ;;  %2161 = vmatpush3.msra.mxu0 %v1412_v39  ;;  %2157 = vmatprep.mubr.msk.f32.mxu1 %vm2309_vm1, %v2308_v15  ;;  %v2006_v36 = vld [vmem:[%s2721_s6] ss:$0 sm:$0xff]  ;;  %s1961_s6 = sshll.u32 %s2316_s29, 4  ;;  %s1962_s6 = int_to_ptr.vmem [resolvable:$true] %s1961_s6 }
 0x51b   :  { %v878_v44 = vmul.f32 %v2275_v40, %v2547_v10  ;;  %2162 = vmatprep.mubr.msk.f32.mxu0 %vm2309_vm1, %v2308_v15  ;;  %2165 = vmatprep.subr.bf16.mxu1 %v2308_v15  ;;  %s2284_s30 = scalar_lea.vmem %s1962_s6, 256  ;;  %p2289_p1 = scmp.lt.s32.totalorder %s1962_s6, %s1962_s6 }
 0x51c   :  { %2158 = vmatmul.mubr.msk.f32.vlgmr.msra.gmra.mrb[20].mxu1 %vm184_vm2, %v877_v41  ;;  %2171 = vmatprep.subr.bf16.mxu0 %v2308_v15  ;;  %p2285_p0 = scmp.ne.s32.totalorder %s1962_s6, %s2284_s30  ;;  %p2290_p2 = scmp.lt.s32.totalorder %s2284_s30, %s2284_s30 }
 0x51d   :  { %2163 = vmatmul.mubr.msk.f32.vlgmr.msra.gmra.mrb[12].mxu0 %vm184_vm2, %v878_v44  ;;  %2166 = vmatpush3.bf16.msra.mxu1 %v1500_v42 }
 0x51e   :  { %2167 = vmatprep.mubr.msk.bf16.mxu1 %vm2309_vm1, %v2308_v15  ;;  %2177 = vmatprep.subr.bf16.mxu1 %v2308_v15  ;;  %p2291_p3 = por %p2290_p2, %p2289_p1 }
 0x51f   :  { %2173 = vmatprep.mubr.msk.bf16.mxu0 %vm2309_vm1, %v2308_v15  ;;  %2172 = vmatpush3.bf16.msra.mxu0 %v1547_v46 }
 0x520   :  { %2183 = vmatprep.subr.bf16.mxu0 %v2308_v15  ;;  %p2292_p4 = pnand %p2291_p3, %p2285_p0 }
 0x58a   :  { %v951_v48 = vpop.f32.mrb[14].mxu1 }
 0x58b   :  { %v2129_v49 = vpop.f32.mrb[15].mxu1 }
 0x593   :  { %v1027_v51 = vpop.f32.mrb[6].mxu0 }
 0x594   :  { %v1487_v52 = vpack.c.bf16 %v1027_v51, %v951_v48  ;;  %v2134_v53 = vpop.f32.mrb[7].mxu0 }
 0x596   :  { %2168 = vmatmul.mubr.msk.bf16.vlgmr.msra.gmra.mrb[24].mxu1 %vm184_vm2, %v1487_v52 }
 0x597   :  { %2178 = vmatpush3.bf16.msra.mxu1 %v1594_v54  ;;  %2179 = vmatprep.mubr.msk.bf16.mxu1 %vm2309_vm1, %v2308_v15 }
 0x598   :  { %2189 = vmatprep.subr.bf16.mxu1 %v2308_v15 }
 0x5e3   :  { %v1103_v55 = vpop.f32.mrb[16].mxu1 }
 0x5e4   :  { %v2139_v56 = vpop.f32.mrb[17].mxu1 }
 0x5e5   :  { %v2230_v56 = vld [vmem:[%s2724_s9] sm:$0xff]  }
 0x5e7   :  { %v1179_v58 = vpop.f32.mrb[8].mxu0 }
 0x5e8   :  { %v1488_v59 = vpack.c.bf16 %v1179_v58, %v1103_v55  ;;  %v2144_v60 = vpop.f32.mrb[9].mxu0 }
 0x5ea   :  { %2174 = vmatmul.mubr.msk.bf16.vlgmr.msra.gmra.mrb[16].mxu0 %vm184_vm2, %v1488_v59 }
 0x5eb   :  { %v1255_v62 = vpop.f32.mrb[18].mxu1  ;;  %2184 = vmatpush3.bf16.msra.mxu0 %v1641_v61  ;;  %2185 = vmatprep.mubr.msk.bf16.mxu0 %vm2309_vm1, %v2308_v15 }
 0x5ec   :  { %v1331_v63 = vpop.f32.mrb[10].mxu0  ;;  %v2149_v2 = vpop.f32.mrb[19].mxu1  ;;  %2197 = vmatprep.subr.bf16.mxu0 %v2308_v15 }
 0x5ed   :  { %v1489_v3 = vpack.c.bf16 %v1331_v63, %v1255_v62  ;;  %v2154_v4 = vpop.f32.mrb[11].mxu0 }
 0x5ee   :  { %v2007_v4 = vld [vmem:[%s2722_s7] ss:$0 sm:$0xff] }
 0x5ef   :  { %2180 = vmatmul.mubr.msk.bf16.vlgmr.msra.gmra.mrb[28].mxu1 %vm184_vm2, %v1489_v3  ;;  %v1407_v5 = vpop.f32.mrb[20].mxu1 }
 0x5f0   :  { %v1483_v6 = vpop.f32.mrb[12].mxu0  ;;  %v2159_v7 = vpop.f32.mrb[21].mxu1  ;;  %2193 = vmatprep.mubr.msk.bf16.mxu1 %vm2309_vm1, %v2308_v15  ;;  %2190 = vmatpush3.bf16.msra.mxu1 %v2230_v56 }
 0x5f1   :  { %v1490_v8 = vpack.c.bf16 %v1483_v6, %v1407_v5  ;;  %v2164_v9 = vpop.f32.mrb[13].mxu0  ;;  %2191 = vmatprep.subr.bf16.mxu1 %v2308_v15 }
 0x5f3   :  { %2186 = vmatmul.mubr.msk.bf16.vlgmr.msra.gmra.mrb[20].mxu0 %vm184_vm2, %v1490_v8  ;;  %v2008_v8 = vld [vmem:[%s2723_s8] ss:$0 sm:$0xff] }
 0x5f4   :  { %2213 = vmatprep.mubr.msk.bf16.mxu0 %vm2309_vm1, %v2308_v15  ;;  %2192 = vmatpush3.bf16.msra.mxu1 %v2231_v57 }
 0x669   :  { %v1536_v10 = vpop.f32.mrb[24].mxu1 }
 0x66a   :  { %v2169_v11 = vpop.f32.mrb[25].mxu1  ;;  %v1684_v16 = vsel %vm50_vm0, %v1536_v10, 0.0 }
 0x66b   :  { %v1539_v12 = vpop.f32.mrb[26].mxu1 }
 0x66c   :  { %v2170_v13 = vpop.f32.mrb[27].mxu1  ;;  %v1691_v21 = vsel %vm50_vm0, %v1539_v12, 0.0 }
 0x66d   :  { %v2232_v13 = vld [vmem:[%s2726_s11] sm:$0xff]  }
 0x66e   :  { %2198 = vmatpush3.bf16.msra.mxu0 %v2232_v13 }
 0x66f   :  { %2199 = vmatprep.subr.bf16.mxu0 %v2308_v15 }
 0x6bd   :  { %v1583_v14 = vpop.f32.mrb[16].mxu0 }
 0x6be   :  { %v1685_v17 = vsel %vm50_vm0, %v1583_v14, 0.0  ;;  %v2175_v18 = vpop.f32.mrb[17].mxu0  ;;  %v2233_v14 = vld [vmem:[%s2726_s11 + $0x8] sm:$0xff]  }
 0x6bf   :  { %v1686_v19 = vadd.f32 %v1685_v17, %v1684_v16  ;;  %v1586_v20 = vpop.f32.mrb[18].mxu0  ;;  %2200 = vmatpush3.bf16.msra.mxu0 %v2233_v14  ;;  %v2234_v16 = vld [vmem:[%s2726_s11 + $0x10] sm:$0xff]   ;;  %v2235_v17 = vld [vmem:[%s2726_s11 + $0x18] sm:$0xff]   ;;  %v2236_v18 = vld [vmem:[%s2726_s11 + $0x20] sm:$0xff]  }
 0x6c0   :  { %v1692_v43 = vsel %vm50_vm0, %v1586_v20, 0.0  ;;  %v2176_v47 = vpop.f32.mrb[19].mxu0  ;;  %2201 = vmatprep.subr.bf16.mxu0 %v2308_v15  ;;  %v2238_v20 = vld [vmem:[%s2726_s11 + $0x30] sm:$0xff]  }
 0x6c1   :  { %v1693_v22 = vadd.f32 %v1692_v43, %v1691_v21  ;;  %v2239_v21 = vld [vmem:[%s2726_s11 + $0x38] sm:$0xff]   ;;  %v2009_v43 = vld [vmem:[%s2725_s10] ss:$0 sm:$0xff] }
 0x6c2   :  { %v1630_v23 = vpop.f32.mrb[28].mxu1 }
 0x6c3   :  { %v1687_v24 = vsel %vm50_vm0, %v1630_v23, 0.0  ;;  %v2181_v25 = vpop.f32.mrb[29].mxu1  ;;  %2202 = vmatpush3.bf16.msra.mxu0 %v2234_v16 }
 0x6c4   :  { %v1688_v26 = vadd.f32 %v1687_v24, %v1686_v19  ;;  %v1633_v27 = vpop.f32.mrb[30].mxu1  ;;  %2203 = vmatprep.subr.bf16.mxu0 %v2308_v15  ;;  %v2237_v19 = vld [vmem:[%s2726_s11 + $0x28] sm:$0xff]  }
 0x6c5   :  { %v1694_v28 = vsel %vm50_vm0, %v1633_v27, 0.0  ;;  %v2182_v29 = vpop.f32.mrb[31].mxu1 }
 0x6c6   :  { %v1695_v30 = vadd.f32 %v1694_v28, %v1693_v22  ;;  %v1677_v31 = vpop.f32.mrb[20].mxu0 }
 0x6c7   :  { %v1689_v32 = vsel %vm50_vm0, %v1677_v31, 0.0  ;;  %v2187_v33 = vpop.f32.mrb[21].mxu0  ;;  %2204 = vmatpush3.bf16.msra.mxu0 %v2235_v17 }
 0x6c8   :  { %v1690_v34 = vadd.f32 %v1689_v32, %v1688_v26  ;;  %v1680_v35 = vpop.f32.mrb[22].mxu0  ;;  %2205 = vmatprep.subr.bf16.mxu0 %v2308_v15 }
 0x6c9   :  { %v1696_v37 = vsel %vm50_vm0, %v1680_v35, 0.0  ;;  %v2188_v38 = vpop.f32.mrb[23].mxu0 }
 0x6ca   :  { %v1698_v39 = vadd.f32 %v1690_v34, %v2392_v0  ;;  %v1697_v40 = vadd.f32 %v1696_v37, %v1695_v30 }
 0x6cb   :  { %2206 = vmatpush3.bf16.msra.mxu0 %v2236_v18 }
 0x6cc   :  { %v1699_v41 = vadd.f32 %v1697_v40, %v2397_v1  ;;  %v2636_v42 = vadd.f32 %v2006_v36, %v1698_v39  ;;  %2207 = vmatprep.subr.bf16.mxu0 %v2308_v15 }
 0x6ce   :  { %v1711_v44 = vsel %vm50_vm0, %v2636_v42, 0.0  ;;  %v2640_v45 = vadd.f32 %v2006_v36, %v1699_v41 }
 0x6cf   :  { %1712 = vadd.xlane.f32.xlu0 %v1711_v44  ;;  %2208 = vmatpush3.bf16.msra.mxu0 %v2237_v19 }
 0x6d0   :  { %v1714_v46 = vsel %vm50_vm0, %v2640_v45, 0.0  ;;  %2209 = vmatprep.subr.bf16.mxu0 %v2308_v15 }
 0x6d1   :  { %1715 = vadd.xlane.f32.xlu1 %v1714_v46 }
 0x6d3   :  { %2210 = vmatpush3.bf16.msra.mxu0 %v2238_v20 }
 0x6d4   :  { %2211 = vmatprep.subr.bf16.mxu0 %v2308_v15 }
 0x6d7   :  { %2212 = vmatpush3.bf16.msra.mxu0 %v2239_v21 }
 0x75c   :  { %v1713_v48 = vpop.xlane.xlu0 %1712 }
 0x75d   :  { %v1717_v49 = vmul.f32 0.03125, %v1713_v48 }
 0x75e   :  { %v1716_v50 = vpop.xlane.xlu1 %1715 }
 0x75f   :  { %v1719_v0 = vsub.f32 %v2636_v42, %v1717_v49  ;;  %v1718_v51 = vmul.f32 0.03125, %v1716_v50  ;;  %v2013_v49 = vld [vmem:[%s2727_s12] ss:$0 sm:$0xff] }
 0x761   :  { %v1720_v1 = vsub.f32 %v2640_v45, %v1718_v51  ;;  %v1721_v52 = vmul.f32 %v1719_v0, %v1719_v0 }
 0x763   :  { %v1723_v53 = vsel %vm50_vm0, %v1721_v52, 0.0  ;;  %v1722_v54 = vmul.f32 %v1720_v1, %v1720_v1 }
 0x764   :  { %1724 = vadd.xlane.f32.xlu0 %v1723_v53 }
 0x765   :  { %v1726_v55 = vsel %vm50_vm0, %v1722_v54, 0.0 }
 0x768   :  { %1727 = vadd.xlane.f32.xlu0 %v1726_v55 }
 0x7f1   :  { %v1725_v58 = vpop.xlane.xlu0 %1724 }
 0x7f2   :  { %v1729_v59 = vmul.f32 0.03125, %v1725_v58 }
 0x7f4   :  { %v1731_v60 = vadd.f32 1e-05, %v1729_v59 }
 0x7f5   :  { %v1728_v61 = vpop.xlane.xlu0 %1727 }
 0x7f6   :  { %2276 = vrsqrt.f32 %v1731_v60  ;;  %v1730_v62 = vmul.f32 0.03125, %v1728_v61 }
 0x7f8   :  { %v1732_v63 = vadd.f32 1e-05, %v1730_v62 }
 0x7fa   :  { %2278 = vrsqrt.f32 %v1732_v63 }
 0x800   :  { %v2277_v2 = vpop.eup %2276 }
 0x801   :  { %v1735_v3 = vmul.f32 %v2277_v2, %v1719_v0 }
 0x803   :  { %v1743_v6 = vmul.f32 %v2007_v4, %v1735_v3 }
 0x804   :  { %v2279_v5 = vpop.eup %2278 }
 0x805   :  { %v1736_v7 = vmul.f32 %v2279_v5, %v1720_v1  ;;  %v1751_v10 = vadd.f32 %v2008_v8, %v1743_v6 }
 0x807   :  { %v1744_v9 = vmul.f32 %v2007_v4, %v1736_v7 }
 0x809   :  { %v1752_v11 = vadd.f32 %v2008_v8, %v1744_v9 }
 0x80b   :  { %v1753_v12 = vpack.c.bf16 %v1752_v11, %v1751_v10 }
 0x80d   :  { %2194 = vmatmul.mubr.msk.bf16.vlgmr.msra.gmra.mrb[32].mxu1 %vm50_vm0, %v1753_v12 }
 0x8e0   :  { %v1814_v47 = vpop.f32.mrb[32].mxu1 }
 0x8e1   :  { %v1815_v22 = vadd.f32 %v2009_v43, %v1814_v47  ;;  %v2195_v23 = vpop.f32.mrb[33].mxu1 }
 0x8e2   :  { %v1817_v24 = vpop.f32.mrb[34].mxu1 }
 0x8e3   :  { %v1823_v25 = vmul.f32 0.044715, %v1815_v22  ;;  %v1818_v26 = vadd.f32 %v2009_v43, %v1817_v24  ;;  %v2196_v27 = vpop.f32.mrb[35].mxu1  ;;  %v1821_v39 = vmul.f32 0.5, %v1815_v22 }
 0x8e5   :  { %v1825_v28 = vmul.f32 %v1823_v25, %v1815_v22  ;;  %v1824_v29 = vmul.f32 0.044715, %v1818_v26  ;;  %v1822_v40 = vmul.f32 0.5, %v1818_v26 }
 0x8e7   :  { %v1827_v30 = vmul.f32 %v1825_v28, %v1815_v22  ;;  %v1826_v31 = vmul.f32 %v1824_v29, %v1818_v26 }
 0x8e9   :  { %v1829_v32 = vadd.f32 %v1827_v30, %v1815_v22  ;;  %v1828_v33 = vmul.f32 %v1826_v31, %v1818_v26 }
 0x8eb   :  { %v1831_v34 = vmul.f32 0.7978846, %v1829_v32  ;;  %v1830_v15 = vadd.f32 %v1828_v33, %v1818_v26 }
 0x8ed   :  { %2280 = vtanh.f32 %v1831_v34  ;;  %v1832_v35 = vmul.f32 0.7978846, %v1830_v15 }
 0x8ef   :  { %2282 = vtanh.f32 %v1832_v35 }
 0x8f7   :  { %v2281_v37 = vpop.eup %2280 }
 0x8f8   :  { %v1835_v38 = vadd.f32 1.0, %v2281_v37 }
 0x8f9   :  { %v2283_v36 = vpop.eup %2282 }
 0x8fa   :  { %v1836_v41 = vadd.f32 1.0, %v2283_v36  ;;  %v1837_v44 = vmul.f32 %v1835_v38, %v1821_v39 }
 0x8fc   :  { %v1838_v46 = vmul.f32 %v1836_v41, %v1822_v40 }
 0x8fe   :  { %v1839_v48 = vpack.c.bf16 %v1838_v46, %v1837_v44 }
 0x900   :  { %2214 = vmatmul.mubr.bf16.vlgmr.msra.gmra.mrb[24].mxu0 %v1839_v48 }
 0x9d3   :  { %v1945_v50 = vpop.f32.mrb[24].mxu0 }
 0x9d4   :  { %v1946_v0 = vadd.f32 %v2013_v49, %v1945_v50  ;;  %v2215_v51 = vpop.f32.mrb[25].mxu0 }
 0x9d5   :  { %v1948_v1 = vpop.f32.mrb[26].mxu0 }
 0x9d6   :  { %v1952_v52 = vadd.f32 %v1946_v0, %v2636_v42  ;;  %v1949_v53 = vadd.f32 %v2013_v49, %v1948_v1  ;;  %v2216_v54 = vpop.f32.mrb[27].mxu0 }
 0x9d8   :  { %1954 = vst.msk [vmem:[#allocation2] sm:$0xff] %vm50_vm0, %v1952_v52  ;;  %v1953_v55 = vadd.f32 %v1949_v53, %v2640_v45 }
 0x9da   :  { %1955 = vst.msk [vmem:[#allocation2 + $0x8] sm:$0xff] %vm50_vm0, %v1953_v55 }
 0x9db   :  { %2295 = shalt.err (!%p2292_p4)
}
 0x9dc   :  { %s2296_s3 = scalar_lea.hbm %s2728_s13, 256 }
 0x9dd   :  { %p2297_p5 = scmp.ne.s32.totalorder %s2728_s13, %s2296_s3  ;;  %p2300_p6 = scmp.lt.u32.totalorder %s2296_s3, %s2728_s13 }
 0x9df   :  { %p2302_p7 = pnand %p2300_p6, %p2297_p5 }
 0x9e1   :  { %2305 = shalt.err (!%p2302_p7)
}
 0x9e2   :  { %s2317_s18 = smov 128   ;;  %s2318_s19 = smov 8  }
 0x9e3   :  { %1967 = dma.vmem_to_hbm [thread:$0]  %s1962_s6, 256, %s2728_s13, [#allocation3], %s2317_s18, %s2317_s18, %s2318_s19  }
 0x9e4   :  { %2306 = dma.done.wait [#allocation3], 256  }
 0x9e5   :  { %2307 = vsyncadd [#allocation3], 4294967040 }
 0x9e6   :  { %1971 = vsyncpa [#allocation3], 1 }

</bundles_post_ra>
